<compile_context>
chip_gen: v7x
topology: tpu7x:2x2x1
jax: 0.10.0
libtpu: 0.0.40
codegen_flags: <defaults>
</compile_context>

<pallas_src>
import functools

import jax
import jax.numpy as jnp
from jax.experimental import pallas as pl
from jax.experimental.pallas import tpu as pltpu

H1P = 128   # padded hidden-1 width   (nH = 16  -> 128 lanes, lane-dense)
HOP = 128   # padded fused-head width (2*nA = 8 -> 128 lanes, lane-dense store)


def _round_up(x, m):
    return (x + m - 1) // m * m


def _policy_kernel(x_ref, slab_ref, out_ref, *, nS_pad, nH2, nA):
    # Single parameter slab (width = nH2 lanes >= 256):
    #   rows [0        : 128)            W2      (full width; rows >= nH are zero)
    #   rows [128      : 136)            b2      (row 128 live)
    #   rows [r_w1     : r_w1 + nS_pad)  W1      in lanes [0:128)
    #   rows [r_b1     : r_b1 + 8)       b1      in lanes [0:128)
    #   rows [r_wh     : r_wh + nH2)     W_head = [Wmean | Wstd | 0...] in lanes [0:128)
    #   rows [r_bh     : r_bh + 8)       b_head in lanes [0:128)
    r_w1 = H1P + 8
    r_b1 = r_w1 + nS_pad
    r_wh = r_b1 + 8
    r_bh = r_wh + nH2

    x = x_ref[...]                                     # (Bp, nS_pad)
    w1 = slab_ref[r_w1:r_w1 + nS_pad, 0:H1P]           # (nS_pad, 128)
    b1 = slab_ref[r_b1:r_b1 + 1, 0:H1P]                # (1, 128)
    w2 = slab_ref[0:H1P, :]                            # (128, nH2)
    b2 = slab_ref[H1P:H1P + 1, :]                      # (1, nH2)
    wh = slab_ref[r_wh:r_wh + nH2, 0:HOP]              # (nH2, 128)
    bh = slab_ref[r_bh:r_bh + 1, 0:HOP]                # (1, 128)

    # h = relu(x @ W1 + b1); padded lanes/rows are exactly 0 (zero weights + zero bias).
    h = jnp.maximum(jnp.dot(x, w1, preferred_element_type=jnp.float32) + b1, 0.0)
    # h2 = relu(h @ W2 + b2); zero-padded rows of W2 contribute exactly 0.
    h2 = jnp.maximum(jnp.dot(h, w2, preferred_element_type=jnp.float32) + b2, 0.0)
    # Fused head: y[:, :nA] = mean pre-act, y[:, nA:2nA] = std pre-act, rest = 0.
    y = jnp.dot(h2, wh, preferred_element_type=jnp.float32) + bh       # (Bp, 128)

    # lanes [0, nA)   -> tanh      (mean head)
    # lanes [nA, ...) -> softplus  (std head; PyTorch F.softplus beta=1, threshold=20)
    lane = jax.lax.broadcasted_iota(jnp.int32, y.shape, 1)
    tanh_y = jnp.tanh(y)
    sp_y = jnp.where(y > 20.0, y, jnp.log1p(jnp.exp(jnp.minimum(y, 20.0))))
    out_ref[...] = jnp.where(lane < nA, tanh_y, sp_y)


def pack_params(params, nS, nH, nA):
    """Pack the 8 PyTorch-style parameter arrays into ONE lane-dense f32 slab."""
    w1, b1, w2, b2, wm, bm, ws, bs = params
    nH2 = nH * nH
    assert nH2 % 128 == 0 and nH2 >= HOP, "nH**2 must be a multiple of 128 (>=128)"
    assert nH <= H1P and 2 * nA <= HOP
    nS_pad = _round_up(nS, 8)
    W = nH2                     # slab lane width
    f32 = jnp.float32

    # Full-width sections: W2 (rows padded to 128) and b2 (padded to 8 rows).
    w2_pad = jnp.zeros((H1P, W), f32).at[:nH, :].set(w2)
    b2_pad = jnp.zeros((8, W), f32).at[0:1, :].set(b2)

    # 128-lane-wide sections, placed in lanes [0:128), zero elsewhere.
    w1_pad = jnp.zeros((nS_pad, W), f32).at[:nS, :nH].set(w1)
    b1_pad = jnp.zeros((8, W), f32).at[0:1, :nH].set(b1)
    wh_pad = jnp.zeros((nH2, W), f32).at[:, :nA].set(wm).at[:, nA:2 * nA].set(ws)
    bh_pad = jnp.zeros((8, W), f32).at[0:1, :nA].set(bm).at[0:1, nA:2 * nA].set(bs)

    slab = jnp.concatenate([w2_pad, b2_pad, w1_pad, b1_pad, wh_pad, bh_pad], axis=0)
    return slab


@functools.partial(jax.jit, static_argnames=("nA",))
def policy_net_forward(x, slab, nA):
    B, nS = x.shape
    nH2 = slab.shape[1]
    nS_pad = _round_up(nS, 8)
    B_pad = _round_up(B, 8)

    # Pad batch to the 8-row sublane tile and features to the 8-aligned W1
    # section height so every load / matmul LHS / store is an unmasked full tile.
    if (B_pad, nS_pad) != (B, nS):
        x_p = jnp.zeros((B_pad, nS_pad), x.dtype).at[:B, :nS].set(x)
    else:
        x_p = x

    kernel = functools.partial(_policy_kernel, nS_pad=nS_pad, nH2=nH2, nA=nA)

    flops = 2 * B_pad * (nS_pad * H1P + H1P * nH2 + nH2 * HOP)
    bytes_accessed = 4 * (x_p.size + slab.size + B_pad * HOP)
    vmem = pl.BlockSpec(memory_space=pltpu.MemorySpace.VMEM)

    out = pl.pallas_call(
        kernel,
        out_shape=jax.ShapeDtypeStruct((B_pad, HOP), jnp.float32),
        in_specs=[vmem, vmem],
        out_specs=vmem,
        cost_estimate=pl.CostEstimate(
            flops=flops, transcendentals=2 * B_pad * HOP,
            bytes_accessed=bytes_accessed),
    )(x_p, slab)

    # Single contiguous slice of the live lanes, then split (fuses under jit).
    # NOTE: padded lanes [2*nA:128) of `out` hold softplus(0)=ln(2), not 0.
    y = out[:B, :2 * nA]
    return y[:, :nA], y[:, nA:]


def init_params(key, nS, nH, nA):
    """Deterministic PyTorch-Linear-style init: U(-1/sqrt(fan_in), 1/sqrt(fan_in))."""
    nH2 = nH * nH

    def linear(key, fan_in, fan_out):
        kw, kb = jax.random.split(key)
        bound = 1.0 / jnp.sqrt(fan_in)
        w = jax.random.uniform(kw, (fan_in, fan_out), jnp.float32, -bound, bound)
        b = jax.random.uniform(kb, (1, fan_out), jnp.float32, -bound, bound)
        return w, b

    k1, k2, k3, k4 = jax.random.split(key, 4)
    w1, b1 = linear(k1, nS, nH)
    w2, b2 = linear(k2, nH, nH2)
    wm, bm = linear(k3, nH2, nA)
    ws, bs = linear(k4, nH2, nA)
    return (w1, b1, w2, b2, wm, bm, ws, bs)


def reference_forward(x, params):
    """Plain-JAX reference matching the PyTorch forward."""
    (w1, b1, w2, b2, wm, bm, ws, bs) = params
    h = jax.nn.relu(x @ w1 + b1)
    h2 = jax.nn.relu(h @ w2 + b2)
    mean = jnp.tanh(h2 @ wm + bm)
    std = jax.nn.softplus(h2 @ ws + bs)
    return mean, std


if __name__ == "__main__":
    # BipedalWalker-ish small shapes: nS=24 obs dims, nH=16 (-> nH^2=256), nA=4 actions.
    B, nS, nH, nA = 2, 24, 16, 4

    key = jax.random.PRNGKey(0)
    kx, kp = jax.random.split(key)
    x = jax.random.normal(kx, (B, nS), jnp.float32)
    params = init_params(kp, nS, nH, nA)
    slab = pack_params(params, nS, nH, nA)

    mean, std = policy_net_forward(x, slab, nA)
    mean, std = jax.block_until_ready((mean, std))

    mean_ref, std_ref = reference_forward(x, params)
    assert mean.shape == (B, nA) and std.shape == (B, nA)
    assert jnp.allclose(mean, mean_ref, atol=1e-5, rtol=1e-5)
    assert jnp.allclose(std, std_ref, atol=1e-5, rtol=1e-5)
    assert bool(jnp.all(std > 0.0))

    print("KERNEL_OK")
</pallas_src>

<mosaic_0001>
module attributes {stable_mosaic.version = 11 : i64} {
  func.func @_policy_kernel(%arg0: memref<8x24xf32, #tpu.memory_space<vmem>>, %arg1: memref<432x256xf32, #tpu.memory_space<vmem>>, %arg2: memref<8x128xf32, #tpu.memory_space<vmem>>) attributes {dimension_semantics = [], scalar_prefetch = 0 : i64, scratch_operands = 0 : i64, tpu.core_type = #tpu.core_type<tc>} {
    %c0 = arith.constant 0 : index
    %c0_0 = arith.constant 0 : index
    %0 = vector.load %arg0[%c0, %c0_0] : memref<8x24xf32, #tpu.memory_space<vmem>>, vector<8x24xf32>
    %c136 = arith.constant 136 : index
    %c0_1 = arith.constant 0 : index
    %1 = vector.load %arg1[%c136, %c0_1] : memref<432x256xf32, #tpu.memory_space<vmem>>, vector<24x128xf32>
    %c160 = arith.constant 160 : index
    %c0_2 = arith.constant 0 : index
    %2 = vector.load %arg1[%c160, %c0_2] : memref<432x256xf32, #tpu.memory_space<vmem>>, vector<1x128xf32>
    %c0_3 = arith.constant 0 : index
    %c0_4 = arith.constant 0 : index
    %3 = vector.load %arg1[%c0_3, %c0_4] : memref<432x256xf32, #tpu.memory_space<vmem>>, vector<128x256xf32>
    %c128 = arith.constant 128 : index
    %c0_5 = arith.constant 0 : index
    %4 = vector.load %arg1[%c128, %c0_5] : memref<432x256xf32, #tpu.memory_space<vmem>>, vector<1x256xf32>
    %c168 = arith.constant 168 : index
    %c0_6 = arith.constant 0 : index
    %5 = vector.load %arg1[%c168, %c0_6] : memref<432x256xf32, #tpu.memory_space<vmem>>, vector<256x128xf32>
    %c424 = arith.constant 424 : index
    %c0_7 = arith.constant 0 : index
    %6 = vector.load %arg1[%c424, %c0_7] : memref<432x256xf32, #tpu.memory_space<vmem>>, vector<1x128xf32>
    %cst = arith.constant dense<0.000000e+00> : vector<8x128xf32>
    %7 = tpu.matmul %0, %1, %cst {dimension_numbers = #tpu.dot_dimension_numbers<[1], [0], [0], [1], [0, 0, 1, 1], [], []>} : vector<8x24xf32>, vector<24x128xf32>, vector<8x128xf32> -> vector<8x128xf32>
    %8 = vector.broadcast %2 : vector<1x128xf32> to vector<8x128xf32>
    %9 = arith.addf %7, %8 : vector<8x128xf32>
    %cst_8 = arith.constant 0.000000e+00 : f32
    %10 = vector.broadcast %cst_8 : f32 to vector<8x128xf32>
    %11 = arith.maximumf %9, %10 : vector<8x128xf32>
    %cst_9 = arith.constant dense<0.000000e+00> : vector<8x256xf32>
    %12 = tpu.matmul %11, %3, %cst_9 {dimension_numbers = #tpu.dot_dimension_numbers<[1], [0], [0], [1], [0, 0, 1, 1], [], []>} : vector<8x128xf32>, vector<128x256xf32>, vector<8x256xf32> -> vector<8x256xf32>
    %13 = vector.broadcast %4 : vector<1x256xf32> to vector<8x256xf32>
    %14 = arith.addf %12, %13 : vector<8x256xf32>
    %cst_10 = arith.constant 0.000000e+00 : f32
    %15 = vector.broadcast %cst_10 : f32 to vector<8x256xf32>
    %16 = arith.maximumf %14, %15 : vector<8x256xf32>
    %cst_11 = arith.constant dense<0.000000e+00> : vector<8x128xf32>
    %17 = tpu.matmul %16, %5, %cst_11 {dimension_numbers = #tpu.dot_dimension_numbers<[1], [0], [0], [1], [0, 0, 1, 1], [], []>} : vector<8x256xf32>, vector<256x128xf32>, vector<8x128xf32> -> vector<8x128xf32>
    %18 = vector.broadcast %6 : vector<1x128xf32> to vector<8x128xf32>
    %19 = arith.addf %17, %18 : vector<8x128xf32>
    %20 = tpu.iota {dimensions = array<i32: 1>} : vector<8x128xi32>
    %21 = math.tanh %19 : vector<8x128xf32>
    %cst_12 = arith.constant 2.000000e+01 : f32
    %22 = vector.broadcast %cst_12 : f32 to vector<8x128xf32>
    %23 = arith.cmpf ogt, %19, %22 : vector<8x128xf32>
    %cst_13 = arith.constant 2.000000e+01 : f32
    %24 = vector.broadcast %cst_13 : f32 to vector<8x128xf32>
    %25 = arith.minimumf %19, %24 : vector<8x128xf32>
    %26 = math.exp %25 : vector<8x128xf32>
    %27 = math.log1p %26 : vector<8x128xf32>
    %28 = arith.select %23, %19, %27 : vector<8x128xi1>, vector<8x128xf32>
    %c4_i32 = arith.constant 4 : i32
    %29 = vector.broadcast %c4_i32 : i32 to vector<8x128xi32>
    %30 = arith.cmpi slt, %20, %29 : vector<8x128xi32>
    %31 = arith.select %30, %21, %28 : vector<8x128xi1>, vector<8x128xf32>
    %c0_14 = arith.constant 0 : index
    %c0_15 = arith.constant 0 : index
    %32 = vector.load %arg2[%c0_14, %c0_15] : memref<8x128xf32, #tpu.memory_space<vmem>>, vector<8x128xf32>
    tpu.vector_store %arg2[%c0_14, %c0_15], %31 {strides = array<i32>} : memref<8x128xf32, #tpu.memory_space<vmem>>, vector<8x128xf32>,
    return
  }
}

</mosaic_0001>

<bundles_post_ra>
// kernel: policy_net_forward.1
= control target key start
LH: loop header
LB: loop body
LE: loop exit
PB: predicated region body
PF: predicated region fallthrough
CT: control target
= control target key end

     0   :  { %7 = vsyncpa [#allocation3], 0  ;;  %s503_s9 = smov [#allocation2]   ;;  %s542_s0 = inlined_call_operand.vmem [shape: f32[8,24], index: 0, kind: input, shape index: {}]   ;;  %s543_s1 = inlined_call_operand.hbm [shape: f32[432,256], index: 1, kind: input, shape index: {}]   ;;  %s544_s2 = inlined_call_operand.vmem [shape: f32[8,128], index: 2, kind: output, shape index: {}]  }
   0x1   :  { %s15_s10 = sshll.u32 %s503_s9, 4  ;;  %s479_s13 = scalar_lea.hbm %s543_s1, 13824  ;;  %s16_s10 = int_to_ptr.vmem [resolvable:$true] %s15_s10 }
   0x2   :  { %p480_p0 = scmp.ne.s32.totalorder %s543_s1, %s479_s13  ;;  %p483_p1 = scmp.lt.u32.totalorder %s479_s13, %s543_s1 }
   0x4   :  { %p485_p2 = pnand %p483_p1, %p480_p0 }
   0x6   :  { %488 = shalt.err (!%p485_p2)
}
   0x7   :  { %s489_s18 = scalar_lea.vmem %s16_s10, 13824  ;;  %p494_p4 = scmp.lt.s32.totalorder %s16_s10, %s16_s10 }
   0x8   :  { %p490_p3 = scmp.ne.s32.totalorder %s16_s10, %s489_s18  ;;  %p495_p5 = scmp.lt.s32.totalorder %s489_s18, %s489_s18 }
   0xa   :  { %p496_p6 = por %p495_p5, %p494_p4 }
   0xc   :  { %p497_p7 = pnand %p496_p6, %p490_p3 }
   0xe   :  { %500 = shalt.err (!%p497_p7)
}
   0xf   :  { %s504_s19 = smov 256   ;;  %s505_s20 = smov 16  }
  0x10   :  { %21 = dma.hbm_to_vmem [thread:$0]  %s543_s1, 13824, %s16_s10, [#allocation3], %s504_s19, %s504_s19, %s505_s20  }
  0x11   :  { %501 = dma.done.wait [#allocation3], 13824  }
  0x12   :  { %502 = vsyncadd [#allocation3], 4294953472  ;;  %v506_v0 = vmov 0.0|0.0   ;;  %vm507_vm0 = vmmov 0   ;;  %v508_v1 = vmov 0.0   ;;  %v26_v2 = vld [vmem:[#allocation2 + $0x110] sm:$0xff] }
  0x13   :  { %400 = vmatprep.subr.bf16.mxu0 %v506_v0  ;;  %397 = vmatprep.mubr.msk.f32.mxu0 %vm507_vm0, %v508_v1  ;;  %v27_v3 = vld [vmem:[#allocation2 + $0x120] sm:$0xff]  ;;  %v31_v5 = vld [vmem:[#allocation2 + $0x8] sm:$0xff]  ;;  %v33_v6 = vld [vmem:[#allocation2 + $0x18] sm:$0xff]  ;;  %vm97_vm1 = vcmask 195584  }
  0x14   :  { %247 = vmatprep.mubr.f32.mxu1 %v508_v1  ;;  %v401_v4 = vpack.c.bf16 %v27_v3, %v26_v2  ;;  %v403_v7 = vpack.c.bf16 %v33_v6, %v31_v5  ;;  %v30_v8 = vld [vmem:[#allocation2] sm:$0xff]  ;;  %v32_v9 = vld [vmem:[#allocation2 + $0x10] sm:$0xff]  ;;  %v35_v10 = vld [vmem:[#allocation2 + $0x28] sm:$0xff] }
  0x15   :  { %v405_v11 = vpack.c.bf16 %v32_v9, %v30_v8  ;;  %v37_v12 = vld [vmem:[#allocation2 + $0x38] sm:$0xff]  ;;  %v34_v13 = vld [vmem:[#allocation2 + $0x20] sm:$0xff]  ;;  %v36_v14 = vld [vmem:[#allocation2 + $0x30] sm:$0xff] }
  0x16   :  { %402 = vmatpush3.bf16.msra.mxu0 %v401_v4  ;;  %v28_v15 = vld [vmem:[#allocation2 + $0x130] sm:$0xff]  ;;  %404 = vmatprep.subr.bf16.mxu1 %v403_v7  ;;  %v407_v16 = vpack.c.bf16 %v37_v12, %v35_v10  ;;  %v39_v17 = vld [vmem:[#allocation2 + $0x48] sm:$0xff]  ;;  %v41_v18 = vld [vmem:[#allocation2 + $0x58] sm:$0xff]  ;;  %v409_v20 = vpack.c.bf16 %v36_v14, %v34_v13 }
  0x17   :  { %395 = vmatprep.subr.mxu0 %v508_v1  ;;  %v25_v19 = vld [vmem:[%s542_s0] sm:$0xff]  ;;  %406 = vmatpush1.bf16.msra.mxu1 %v405_v11  ;;  %v411_v21 = vpack.c.bf16 %v41_v18, %v39_v17  ;;  %v40_v23 = vld [vmem:[#allocation2 + $0x50] sm:$0xff]  ;;  %v43_v24 = vld [vmem:[#allocation2 + $0x68] sm:$0xff] }
  0x18   :  { %408 = vmatprep.subr.bf16.mxu1 %v407_v16  ;;  %v38_v22 = vld [vmem:[#allocation2 + $0x40] sm:$0xff]  ;;  %v45_v25 = vld [vmem:[#allocation2 + $0x78] sm:$0xff]  ;;  %v44_v29 = vld [vmem:[#allocation2 + $0x70] sm:$0xff] }
  0x19   :  { %v413_v26 = vpack.c.bf16 %v40_v23, %v38_v22  ;;  %v415_v27 = vpack.c.bf16 %v45_v25, %v43_v24  ;;  %v42_v28 = vld [vmem:[#allocation2 + $0x60] sm:$0xff]  ;;  %v47_v30 = vld [vmem:[#allocation2 + $0x88] sm:$0xff]  ;;  %v49_v31 = vld [vmem:[#allocation2 + $0x98] sm:$0xff] }
  0x1a   :  { %396 = vmatpush3.msra.mxu0 %v28_v15  ;;  %v417_v32 = vpack.c.bf16 %v44_v29, %v42_v28  ;;  %v419_v33 = vpack.c.bf16 %v49_v31, %v47_v30  ;;  %v46_v34 = vld [vmem:[#allocation2 + $0x80] sm:$0xff]  ;;  %v48_v35 = vld [vmem:[#allocation2 + $0x90] sm:$0xff]  ;;  %v51_v36 = vld [vmem:[#allocation2 + $0xa8] sm:$0xff] }
  0x1b   :  { %398 = vmatmul.mubr.msk.f32.vlgmr.msra.gmra.mrb[0].mxu0 %vm97_vm1, %v25_v19  ;;  %410 = vmatpush1.bf16.msra.mxu1 %v409_v20  ;;  %v53_v37 = vld [vmem:[#allocation2 + $0xb8] sm:$0xff]  ;;  %v421_v38 = vpack.c.bf16 %v48_v35, %v46_v34  ;;  %v50_v40 = vld [vmem:[#allocation2 + $0xa0] sm:$0xff]  ;;  %v52_v41 = vld [vmem:[#allocation2 + $0xb0] sm:$0xff] }
  0x1c   :  { %412 = vmatprep.subr.bf16.mxu1 %v411_v21  ;;  %v423_v39 = vpack.c.bf16 %v53_v37, %v51_v36  ;;  %v55_v42 = vld [vmem:[#allocation2 + $0xc8] sm:$0xff]  ;;  %v57_v43 = vld [vmem:[#allocation2 + $0xd8] sm:$0xff]  ;;  %v425_v44 = vpack.c.bf16 %v52_v41, %v50_v40  ;;  %v54_v46 = vld [vmem:[#allocation2 + $0xc0] sm:$0xff] }
  0x1d   :  { %v427_v45 = vpack.c.bf16 %v57_v43, %v55_v42  ;;  %v56_v47 = vld [vmem:[#allocation2 + $0xd0] sm:$0xff]  ;;  %v59_v49 = vld [vmem:[#allocation2 + $0xe8] sm:$0xff]  ;;  %v61_v50 = vld [vmem:[#allocation2 + $0xf8] sm:$0xff] }
  0x1e   :  { %v429_v48 = vpack.c.bf16 %v56_v47, %v54_v46  ;;  %v431_v51 = vpack.c.bf16 %v61_v50, %v59_v49  ;;  %v58_v52 = vld [vmem:[#allocation2 + $0xe0] sm:$0xff]  ;;  %v60_v53 = vld [vmem:[#allocation2 + $0xf0] sm:$0xff] }
  0x1f   :  { %414 = vmatpush1.bf16.msra.mxu1 %v413_v26  ;;  %v433_v54 = vpack.c.bf16 %v60_v53, %v58_v52  ;;  %v80_v55 = vld [vmem:[#allocation2 + $0x250] sm:$0xff]  ;;  %v81_v56 = vld [vmem:[#allocation2 + $0x260] sm:$0xff] }
  0x20   :  { %416 = vmatprep.subr.bf16.mxu1 %v415_v27  ;;  %v64_v57 = vld [vmem:[#allocation2 + $0x150] sm:$0xff]  ;;  %v435_v58 = vpack.c.bf16 %v81_v56, %v80_v55  ;;  %v65_v59 = vld [vmem:[#allocation2 + $0x160] sm:$0xff] }
  0x21   :  { %v82_v60 = vld [vmem:[#allocation2 + $0x270] sm:$0xff]  ;;  %v83_v61 = vld [vmem:[#allocation2 + $0x280] sm:$0xff]  ;;  %v437_v62 = vpack.c.bf16 %v65_v59, %v64_v57 }
  0x22   :  { %v439_v63 = vpack.c.bf16 %v83_v61, %v82_v60  ;;  %v66_v0 = vld [vmem:[#allocation2 + $0x170] sm:$0xff]  ;;  %v67_v1 = vld [vmem:[#allocation2 + $0x180] sm:$0xff]  ;;  %436 = vmatprep.subr.bf16.mxu0 %v435_v58 }
  0x23   :  { %418 = vmatpush1.bf16.msra.mxu1 %v417_v32  ;;  %v84_v2 = vld [vmem:[#allocation2 + $0x290] sm:$0xff]  ;;  %v85_v3 = vld [vmem:[#allocation2 + $0x2a0] sm:$0xff]  ;;  %438 = vmatpush3.bf16.msra.mxu0 %v437_v62  ;;  %v441_v4 = vpack.c.bf16 %v67_v1, %v66_v0 }
  0x24   :  { %420 = vmatprep.subr.bf16.mxu1 %v419_v33  ;;  %440 = vmatprep.subr.bf16.mxu0 %v439_v63  ;;  %v443_v5 = vpack.c.bf16 %v85_v3, %v84_v2  ;;  %v68_v6 = vld [vmem:[#allocation2 + $0x190] sm:$0xff]  ;;  %v69_v7 = vld [vmem:[#allocation2 + $0x1a0] sm:$0xff] }
  0x25   :  { %v86_v8 = vld [vmem:[#allocation2 + $0x2b0] sm:$0xff]  ;;  %v87_v9 = vld [vmem:[#allocation2 + $0x2c0] sm:$0xff]  ;;  %v445_v10 = vpack.c.bf16 %v69_v7, %v68_v6 }
  0x26   :  { %v447_v11 = vpack.c.bf16 %v87_v9, %v86_v8  ;;  %v70_v12 = vld [vmem:[#allocation2 + $0x1b0] sm:$0xff]  ;;  %v71_v13 = vld [vmem:[#allocation2 + $0x1c0] sm:$0xff] }
  0x27   :  { %422 = vmatpush1.bf16.msra.mxu1 %v421_v38  ;;  %442 = vmatpush3.bf16.msra.mxu0 %v441_v4  ;;  %v88_v14 = vld [vmem:[#allocation2 + $0x2d0] sm:$0xff]  ;;  %v89_v15 = vld [vmem:[#allocation2 + $0x2e0] sm:$0xff]  ;;  %v449_v16 = vpack.c.bf16 %v71_v13, %v70_v12 }
  0x28   :  { %424 = vmatprep.subr.bf16.mxu1 %v423_v39  ;;  %444 = vmatprep.subr.bf16.mxu0 %v443_v5  ;;  %v451_v17 = vpack.c.bf16 %v89_v15, %v88_v14  ;;  %v72_v18 = vld [vmem:[#allocation2 + $0x1d0] sm:$0xff]  ;;  %v73_v19 = vld [vmem:[#allocation2 + $0x1e0] sm:$0xff] }
  0x29   :  { %v90_v20 = vld [vmem:[#allocation2 + $0x2f0] sm:$0xff]  ;;  %v91_v21 = vld [vmem:[#allocation2 + $0x300] sm:$0xff]  ;;  %v453_v22 = vpack.c.bf16 %v73_v19, %v72_v18 }
  0x2a   :  { %v455_v23 = vpack.c.bf16 %v91_v21, %v90_v20  ;;  %v74_v24 = vld [vmem:[#allocation2 + $0x1f0] sm:$0xff]  ;;  %v75_v25 = vld [vmem:[#allocation2 + $0x200] sm:$0xff] }
  0x2b   :  { %426 = vmatpush1.bf16.msra.mxu1 %v425_v44  ;;  %446 = vmatpush3.bf16.msra.mxu0 %v445_v10  ;;  %v92_v26 = vld [vmem:[#allocation2 + $0x310] sm:$0xff]  ;;  %v93_v27 = vld [vmem:[#allocation2 + $0x320] sm:$0xff]  ;;  %v457_v28 = vpack.c.bf16 %v75_v25, %v74_v24  ;;  %v173_v44 = vlaneseq }
  0x2c   :  { %428 = vmatprep.subr.bf16.mxu1 %v427_v45  ;;  %448 = vmatprep.subr.bf16.mxu0 %v447_v11  ;;  %v459_v29 = vpack.c.bf16 %v93_v27, %v92_v26  ;;  %v29_v30 = vld [vmem:[#allocation2 + $0x140] ss:$0 sm:$0xff]  ;;  %v76_v35 = vld [vmem:[#allocation2 + $0x210] sm:$0xff] }
  0x2d   :  { %v77_v36 = vld [vmem:[#allocation2 + $0x220] sm:$0xff]  ;;  %v94_v38 = vld [vmem:[#allocation2 + $0x330] sm:$0xff]  ;;  %v174_v45 = vshrl.u32 %v173_v44, 7  ;;  %v327_v4 = vand.u32 127, %v173_v44 }
  0x2e   :  { %v461_v37 = vpack.c.bf16 %v77_v36, %v76_v35  ;;  %v95_v39 = vld [vmem:[#allocation2 + $0x340] sm:$0xff]  ;;  %v78_v41 = vld [vmem:[#allocation2 + $0x230] sm:$0xff] }
  0x2f   :  { %430 = vmatpush1.bf16.msra.mxu1 %v429_v48  ;;  %450 = vmatpush3.bf16.msra.mxu0 %v449_v16  ;;  %v463_v40 = vpack.c.bf16 %v95_v39, %v94_v38  ;;  %v79_v42 = vld [vmem:[#allocation2 + $0x240] sm:$0xff]  ;;  %v175_v46 = vsub.s32 0, %v174_v45  ;;  %v179_v48 = vsub.s32 1, %v174_v45  ;;  %v96_v58 = vld [vmem:[#allocation2 + $0x350] ss:$0 sm:$0xff]  ;;  %vm343_vm2 = vcmp.lt.s32.totalorder %v327_v4, 4 }
  0x30   :  { %432 = vmatprep.subr.bf16.mxu1 %v431_v51  ;;  %452 = vmatprep.subr.bf16.mxu0 %v451_v17  ;;  %v465_v43 = vpack.c.bf16 %v79_v42, %v78_v41  ;;  %v63_v47 = vld [vmem:[#allocation2 + $0x100] ss:$8 sm:$0x3] }
  0x31   :  { %v176_v49 = vrot.slane %v63_v47, %v175_v46  ;;  %v180_v50 = vrot.slane %v63_v47, %v179_v48 }
  0x33   :  { %434 = vmatpush1.bf16.msra.mxu1 %v433_v54  ;;  %454 = vmatpush3.bf16.msra.mxu0 %v453_v22 }
  0x34   :  { %456 = vmatprep.subr.bf16.mxu0 %v455_v23 }
  0x37   :  { %458 = vmatpush3.bf16.msra.mxu0 %v457_v28 }
  0x38   :  { %460 = vmatprep.subr.bf16.mxu0 %v459_v29 }
  0x3b   :  { %462 = vmatpush3.bf16.msra.mxu0 %v461_v37 }
  0x3c   :  { %464 = vmatprep.subr.bf16.mxu0 %v463_v40 }
  0x3f   :  { %466 = vmatpush3.bf16.msra.mxu0 %v465_v43 }
  0xee   :  { %v167_v31 = vpop.f32.mrb[0].mxu0 }
  0xef   :  { %v168_v32 = vadd.f32 %v167_v31, %v29_v30  ;;  %v399_v33 = vpop.f32.mrb[1].mxu0 }
  0xf1   :  { %v171_v34 = vmax.f32 %v168_v32, 0.0 }
  0xf3   :  { %248 = vmatmul.mubr.f32.vlgmr.msra.gmra.mrb[0].mxu1 %v171_v34 }
 0x1c6   :  { %v249_v51 = vpop.f32.mrb[0].mxu1 }
 0x1c7   :  { %v250_v52 = vadd.f32 %v249_v51, %v176_v49  ;;  %v251_v53 = vpop.f32.mrb[1].mxu1 }
 0x1c8   :  { %v252_v54 = vadd.f32 %v251_v53, %v180_v50 }
 0x1c9   :  { %v254_v56 = vmax.f32 %v250_v52, 0.0 }
 0x1ca   :  { %v255_v55 = vmax.f32 %v252_v54, 0.0 }
 0x1cc   :  { %320 = vmatprep.mubr.f32.mxu0 %v255_v55 }
 0x1cd   :  { %321 = vmatmul.mubr.f32.vlgmr.msra.gmra.mrb[2].mxu0 %v254_v56 }
 0x2a0   :  { %v388_v57 = vpop.f32.mrb[2].mxu0 }
 0x2a1   :  { %v389_v59 = vpop.f32.mrb[3].mxu0 }
 0x2a2   :  { %v390_v60 = vadd.f32 %v389_v59, %v388_v57 }
 0x2a4   :  { %v323_v61 = vadd.f32 %v390_v60, %v96_v58 }
 0x2a6   :  { %v330_v62 = vmin.f32 %v323_v61, 20.0  ;;  %vm329_vm4 = vcmp.gt.f32.partialorder %v323_v61, 20.0 }
 0x2a8   :  { %v331_v63 = vmul.f32 1.442695, %v330_v62 }
 0x2aa   :  { %473 = vpow2.f32 %v331_v63 }
 0x2b4   :  { %v474_v0 = vpop.eup %473 }
 0x2b5   :  { %v333_v1 = vadd.f32 1.0, %v474_v0  ;;  %v336_v2 = vmul.f32 -0.5, %v474_v0  ;;  %v339_v5 = vand.u32 2147483647, %v474_v0 }
 0x2b7   :  { %475 = vlog2.f32 %v333_v1  ;;  %v337_v3 = vadd.f32 1.0, %v336_v2  ;;  %vm340_vm3 = vcmp.lt.f32.partialorder %v339_v5, 0.0004427343 }
 0x2b8   :  { %477 = vtanh.f32 %v323_v61 }
 0x2b9   :  { %v338_v8 = vmul.f32 %v474_v0, %v337_v3 }
 0x2c1   :  { %v476_v6 = vpop.eup %475 }
 0x2c2   :  { %v335_v7 = vmul.f32 0.6931472, %v476_v6  ;;  %v478_v10 = vpop.eup %477 }
 0x2c4   :  { %v341_v9 = vsel %vm340_vm3, %v338_v8, %v335_v7 }
 0x2c5   :  { %v342_v11 = vsel %vm329_vm4, %v323_v61, %v341_v9 }
 0x2c6   :  { %v344_v12 = vsel %vm343_vm2, %v478_v10, %v342_v11 }
 0x2c7   :  { %345 = vst [vmem:[%s544_s2] sm:$0xff] %v344_v12 }
 0x2c8   :  { %350 = vsyncpa [#allocation3], 1 }

</bundles_post_ra>
